<compile_context>
chip_gen: v7x
topology: tpu7x:2x2x1
jax: 0.10.0
libtpu: 0.0.40
codegen_flags: <defaults>
</compile_context>

<pallas_src>
import functools

import jax
import jax.numpy as jnp
from jax.experimental import pallas as pl
from jax.experimental.pallas import tpu as pltpu


# ----------------------------------------------------------------------------
# Pallas kernel: fused avg-pool + fc(+BN folded)+ReLU + all heads + activations
# One grid step per batch tile of B rows.
# ----------------------------------------------------------------------------
def _make_omni_kernel(HW, k_off, k_num):
    inv_hw = 1.0 / float(HW)

    def kernel(x_ref, w1_ref, b1_ref, w2_ref, b2_ref, o_ref):
        # ---- load native-dtype tile, upcast, global average pool over H*W ----
        x = x_ref[...].astype(jnp.float32)                    # (B, C, HW)
        pooled = jnp.sum(x, axis=2) * inv_hw                  # (B, C)

        # ---- fc with folded BN (MXU), then ReLU ----
        hidden = jnp.dot(pooled, w1_ref[...],
                         preferred_element_type=jnp.float32) + b1_ref[...]   # (B, A)
        hidden = jnp.maximum(hidden, 0.0)

        # ---- all attention heads as ONE MXU matmul into a 128-wide lane slab ----
        logits = jnp.dot(hidden, w2_ref[...],
                         preferred_element_type=jnp.float32) + b2_ref[...]   # (B, Cp)

        sig = jax.nn.sigmoid(logits)
        if k_num > 1:
            # masked softmax over the kernel-attention lanes [k_off, k_off + k_num)
            lane = jax.lax.broadcasted_iota(jnp.int32, logits.shape, 1)
            kmask = jnp.logical_and(lane >= k_off, lane < k_off + k_num)
            masked = jnp.where(kmask, logits, -jnp.inf)
            kmax = jnp.max(masked, axis=1, keepdims=True)
            kexp = jnp.exp(masked - kmax)                     # non-kernel lanes -> exp(-inf)=0
            ksum = jnp.sum(kexp, axis=1, keepdims=True)
            out_rows = jnp.where(kmask, kexp / ksum, sig)
        else:
            out_rows = sig

        o_ref[...] = out_rows                                 # dense (B, Cp) store

    return kernel


# ----------------------------------------------------------------------------
# Wrapper: fold BN + temperature into weights, pack heads, batch-tile, call kernel.
# ----------------------------------------------------------------------------
def omni_attention_forward(x_nchw, params, cfg, eps=1e-5):
    N, C, H, W = x_nchw.shape
    in_planes = cfg["in_planes"]
    assert C == in_planes
    A = cfg["attention_channel"]
    K = cfg["kernel_size"]
    k_num = cfg["kernel_num"]
    inv_t = 1.0 / cfg["temperature"]

    # Fold eval-mode BatchNorm into the fc weights: h = pooled @ w1 + b1
    gamma, beta, mean, var = params["bn"]
    scale = gamma / jnp.sqrt(var + eps)
    w1 = params["fc_w"].T * scale[None, :]                    # (C, A)
    b1 = (beta - mean * scale)[None, :]                       # (1, A)

    # Concatenate all present heads into a single (A, Ctot) matrix; fold 1/T in.
    heads = [("channel", in_planes)]
    if cfg["has_filter"]:
        heads.append(("filter", cfg["out_planes"]))
    if cfg["has_spatial"]:
        heads.append(("spatial", K * K))
    if cfg["has_kernel"]:
        heads.append(("kernel", k_num))

    w2_parts, b2_parts, offsets = [], [], {}
    off = 0
    for name, width in heads:
        w2_parts.append(params[name + "_w"].T * inv_t)        # (A, width)
        b2_parts.append(params[name + "_b"] * inv_t)          # (width,)
        offsets[name] = (off, width)
        off += width
    c_tot = off
    Cp = max(128, -(-c_tot // 128) * 128)                     # lane-dense output width
    w2 = jnp.pad(jnp.concatenate(w2_parts, axis=1), ((0, 0), (0, Cp - c_tot)))
    b2 = jnp.pad(jnp.concatenate(b2_parts, axis=0), (0, Cp - c_tot))[None, :]

    k_off = offsets["kernel"][0] if cfg["has_kernel"] else 0
    k_cnt = k_num if cfg["has_kernel"] else 1

    # ---- batch tiling: keep x in its native dtype, pick B so the double-buffered
    #      x tile stays ~<=8 MiB (safe on v5e 16 MiB / v6e 32 MiB / v7x 32 MiB scoped VMEM).
    HW = H * W
    x3 = x_nchw.reshape(N, C, HW)                             # native dtype, lane axis = H*W
    itemsize = x3.dtype.itemsize
    bytes_per_row = C * HW * itemsize
    n_up8 = -(-N // 8) * 8
    b_cap = max(8, min(512, (4 << 20) // max(bytes_per_row, 1)))
    b_cap = (b_cap // 8) * 8
    B = min(b_cap, n_up8)                                     # multiple of 8, >= 8
    n_pad = -(-N // B) * B
    if n_pad != N:
        x3 = jnp.pad(x3, ((0, n_pad - N), (0, 0), (0, 0)))    # zero tail rows (sliced off later)
    grid = n_pad // B

    kernel = _make_omni_kernel(HW, k_off, k_cnt)

    flops = n_pad * (C * HW + 2 * C * A + 2 * A * Cp + 5 * Cp)
    transcendentals = n_pad * (Cp + k_cnt)
    bytes_accessed = (itemsize * n_pad * C * HW
                      + 4 * (C * A + A + A * Cp + Cp + n_pad * Cp))

    out = pl.pallas_call(
        kernel,
        out_shape=jax.ShapeDtypeStruct((n_pad, Cp), jnp.float32),
        grid_spec=pltpu.PrefetchScalarGridSpec(
            num_scalar_prefetch=0,
            grid=(grid,),
            in_specs=[
                pl.BlockSpec((B, C, HW), lambda n: (n, 0, 0)),   # x: batched, lane-dense
                pl.BlockSpec((C, A), lambda n: (0, 0)),          # fc (BN folded)
                pl.BlockSpec((1, A), lambda n: (0, 0)),
                pl.BlockSpec((A, Cp), lambda n: (0, 0)),         # all heads, packed
                pl.BlockSpec((1, Cp), lambda n: (0, 0)),
            ],
            out_specs=pl.BlockSpec((B, Cp), lambda n: (n, 0)),   # (B,128) unmasked slabs
        ),
        compiler_params=pltpu.CompilerParams(
            dimension_semantics=("parallel",)),
        cost_estimate=pl.CostEstimate(
            flops=flops, transcendentals=transcendentals,
            bytes_accessed=bytes_accessed),
    )(x3, w1, b1, w2, b2)

    flat = out[:N]                                            # drop padded rows -> (N, Cp)

    def take(name):
        o, wdt = offsets[name]
        return flat[:, o:o + wdt]

    channel_att = take("channel").reshape(N, in_planes, 1, 1)
    filter_att = (take("filter").reshape(N, cfg["out_planes"], 1, 1)
                  if cfg["has_filter"] else 1.0)
    spatial_att = (take("spatial").reshape(N, 1, 1, 1, K, K)
                   if cfg["has_spatial"] else 1.0)
    kernel_att = (take("kernel").reshape(N, k_num, 1, 1, 1, 1)
                  if cfg["has_kernel"] else 1.0)
    return channel_att, filter_att, spatial_att, kernel_att


# ----------------------------------------------------------------------------
# Deterministic synthetic parameters matching the PyTorch module structure.
# ----------------------------------------------------------------------------
def make_params(key, in_planes, out_planes, kernel_size, groups=1,
                reduction=0.0625, kernel_num=4, min_channel=16, temperature=1.0):
    A = max(int(in_planes * reduction), min_channel)
    has_filter = not (in_planes == groups and in_planes == out_planes)
    has_spatial = kernel_size != 1
    has_kernel = kernel_num != 1

    keys = iter(jax.random.split(key, 16))

    def dense(k, out_c, in_c):
        return 0.2 * jax.random.normal(k, (out_c, in_c), jnp.float32)

    p = {}
    p["fc_w"] = dense(next(keys), A, in_planes)                        # 1x1 conv, no bias
    p["bn"] = (1.0 + 0.1 * jax.random.normal(next(keys), (A,), jnp.float32),   # gamma
               0.1 * jax.random.normal(next(keys), (A,), jnp.float32),         # beta
               0.1 * jax.random.normal(next(keys), (A,), jnp.float32),         # running mean
               0.5 + jnp.abs(jax.random.normal(next(keys), (A,), jnp.float32)))  # running var
    p["channel_w"] = dense(next(keys), in_planes, A)
    p["channel_b"] = 0.1 * jax.random.normal(next(keys), (in_planes,), jnp.float32)
    if has_filter:
        p["filter_w"] = dense(next(keys), out_planes, A)
        p["filter_b"] = 0.1 * jax.random.normal(next(keys), (out_planes,), jnp.float32)
    if has_spatial:
        p["spatial_w"] = dense(next(keys), kernel_size * kernel_size, A)
        p["spatial_b"] = 0.1 * jax.random.normal(next(keys), (kernel_size * kernel_size,),
                                                 jnp.float32)
    if has_kernel:
        p["kernel_w"] = dense(next(keys), kernel_num, A)
        p["kernel_b"] = 0.1 * jax.random.normal(next(keys), (kernel_num,), jnp.float32)

    cfg = dict(in_planes=in_planes, out_planes=out_planes, kernel_size=kernel_size,
               kernel_num=kernel_num, groups=groups, attention_channel=A,
               temperature=temperature, has_filter=has_filter,
               has_spatial=has_spatial, has_kernel=has_kernel)
    return p, cfg


# ----------------------------------------------------------------------------
# Pure-JAX reference (eval-mode BN) for correctness checking.
# ----------------------------------------------------------------------------
def reference_forward(x_nchw, params, cfg, eps=1e-5):
    N = x_nchw.shape[0]
    K = cfg["kernel_size"]
    k_num = cfg["kernel_num"]
    T = cfg["temperature"]

    pooled = jnp.mean(x_nchw.astype(jnp.float32), axis=(2, 3))   # (N, C)
    h = pooled @ params["fc_w"].T                                # (N, A)
    gamma, beta, mean, var = params["bn"]
    h = (h - mean) / jnp.sqrt(var + eps) * gamma + beta
    h = jnp.maximum(h, 0.0)

    def head(name):
        return h @ params[name + "_w"].T + params[name + "_b"]

    channel_att = jax.nn.sigmoid(head("channel") / T).reshape(N, cfg["in_planes"], 1, 1)
    filter_att = (jax.nn.sigmoid(head("filter") / T).reshape(N, cfg["out_planes"], 1, 1)
                  if cfg["has_filter"] else 1.0)
    spatial_att = (jax.nn.sigmoid(head("spatial") / T).reshape(N, 1, 1, 1, K, K)
                   if cfg["has_spatial"] else 1.0)
    kernel_att = (jax.nn.softmax(head("kernel") / T, axis=1).reshape(N, k_num, 1, 1, 1, 1)
                  if cfg["has_kernel"] else 1.0)
    return channel_att, filter_att, spatial_att, kernel_att


if __name__ == "__main__":
    key = jax.random.PRNGKey(0)
    kp, kx = jax.random.split(key)

    # OmniAttention(in_planes=16, out_planes=16, kernel_size=3, groups=1,
    #               reduction=0.0625, kernel_num=4, min_channel=16)
    #   -> attention_channel = 16; all four heads active.
    N, C, H, W = 2, 16, 16, 16
    params, cfg = make_params(kp, in_planes=C, out_planes=16, kernel_size=3,
                              groups=1, reduction=0.0625, kernel_num=4, min_channel=16)

    x = jax.random.normal(kx, (N, C, H, W), jnp.float32)

    outs = omni_attention_forward(x, params, cfg)
    outs = jax.block_until_ready(outs)

    refs = reference_forward(x, params, cfg)
    names = ("channel", "filter", "spatial", "kernel")
    for name, o, r in zip(names, outs, refs):
        if isinstance(r, float):
            assert o == r, f"{name}: skip branch mismatch"
        else:
            assert o.shape == r.shape, f"{name}: shape {o.shape} vs {r.shape}"
            err = float(jnp.max(jnp.abs(o - r)))
            assert err < 1e-4, f"{name}: max abs err {err}"

    print("KERNEL_OK")
</pallas_src>

<mosaic_0001>
module attributes {stable_mosaic.version = 11 : i64} {
  func.func @kernel(%arg0: i32, %arg1: memref<8x16x256xf32, #tpu.memory_space<vmem>>, %arg2: memref<16x16xf32, #tpu.memory_space<vmem>>, %arg3: memref<1x16xf32, #tpu.memory_space<vmem>>, %arg4: memref<16x128xf32, #tpu.memory_space<vmem>>, %arg5: memref<1x128xf32, #tpu.memory_space<vmem>>, %arg6: memref<8x128xf32, #tpu.memory_space<vmem>>) attributes {dimension_semantics = [#tpu.dimension_semantics<parallel>], iteration_bounds = array<i64: 1>, scalar_prefetch = 0 : i64, scratch_operands = 0 : i64, tpu.core_type = #tpu.core_type<tc>, window_params = [{transform_indices = @transform_0, window_bounds = array<i64: 8, 16, 256>}, {pipeline_mode = #tpu.pipeline_mode<synchronous>, transform_indices = @transform_1, window_bounds = array<i64: 16, 16>}, {pipeline_mode = #tpu.pipeline_mode<synchronous>, transform_indices = @transform_2, window_bounds = array<i64: 1, 16>}, {pipeline_mode = #tpu.pipeline_mode<synchronous>, transform_indices = @transform_3, window_bounds = array<i64: 16, 128>}, {pipeline_mode = #tpu.pipeline_mode<synchronous>, transform_indices = @transform_4, window_bounds = array<i64: 1, 128>}, {transform_indices = @transform_5, window_bounds = array<i64: 8, 128>}]} {
    %c0 = arith.constant 0 : index
    %c0_0 = arith.constant 0 : index
    %c0_1 = arith.constant 0 : index
    %0 = vector.load %arg1[%c0, %c0_0, %c0_1] : memref<8x16x256xf32, #tpu.memory_space<vmem>>, vector<8x16x256xf32>
    %cst = arith.constant dense<0.000000e+00> : vector<8x16xf32>
    %1 = vector.multi_reduction <add>, %0, %cst [2] : vector<8x16x256xf32> to vector<8x16xf32>
    %cst_2 = arith.constant 3.906250e-03 : f32
    %2 = vector.broadcast %cst_2 : f32 to vector<8x16xf32>
    %3 = arith.mulf %1, %2 : vector<8x16xf32>
    %c0_3 = arith.constant 0 : index
    %c0_4 = arith.constant 0 : index
    %4 = vector.load %arg2[%c0_3, %c0_4] : memref<16x16xf32, #tpu.memory_space<vmem>>, vector<16x16xf32>
    %cst_5 = arith.constant dense<0.000000e+00> : vector<8x16xf32>
    %5 = tpu.matmul %3, %4, %cst_5 {dimension_numbers = #tpu.dot_dimension_numbers<[1], [0], [0], [1], [0, 0, 1, 1], [], []>} : vector<8x16xf32>, vector<16x16xf32>, vector<8x16xf32> -> vector<8x16xf32>
    %c0_6 = arith.constant 0 : index
    %c0_7 = arith.constant 0 : index
    %6 = vector.load %arg3[%c0_6, %c0_7] : memref<1x16xf32, #tpu.memory_space<vmem>>, vector<1x16xf32>
    %7 = vector.broadcast %6 : vector<1x16xf32> to vector<8x16xf32>
    %8 = arith.addf %5, %7 : vector<8x16xf32>
    %cst_8 = arith.constant 0.000000e+00 : f32
    %9 = vector.broadcast %cst_8 : f32 to vector<8x16xf32>
    %10 = arith.maximumf %8, %9 : vector<8x16xf32>
    %c0_9 = arith.constant 0 : index
    %c0_10 = arith.constant 0 : index
    %11 = vector.load %arg4[%c0_9, %c0_10] : memref<16x128xf32, #tpu.memory_space<vmem>>, vector<16x128xf32>
    %cst_11 = arith.constant dense<0.000000e+00> : vector<8x128xf32>
    %12 = tpu.matmul %10, %11, %cst_11 {dimension_numbers = #tpu.dot_dimension_numbers<[1], [0], [0], [1], [0, 0, 1, 1], [], []>} : vector<8x16xf32>, vector<16x128xf32>, vector<8x128xf32> -> vector<8x128xf32>
    %c0_12 = arith.constant 0 : index
    %c0_13 = arith.constant 0 : index
    %13 = vector.load %arg5[%c0_12, %c0_13] : memref<1x128xf32, #tpu.memory_space<vmem>>, vector<1x128xf32>
    %14 = vector.broadcast %13 : vector<1x128xf32> to vector<8x128xf32>
    %15 = arith.addf %12, %14 : vector<8x128xf32>
    %16 = arith.negf %15 : vector<8x128xf32>
    %17 = math.exp %16 : vector<8x128xf32>
    %cst_14 = arith.constant 1.000000e+00 : f32
    %18 = vector.broadcast %cst_14 : f32 to vector<8x128xf32>
    %19 = arith.addf %18, %17 : vector<8x128xf32>
    %20 = arith.divf %18, %19 : vector<8x128xf32>
    %21 = tpu.iota {dimensions = array<i32: 1>} : vector<8x128xi32>
    %c41_i32 = arith.constant 41 : i32
    %22 = vector.broadcast %c41_i32 : i32 to vector<8x128xi32>
    %23 = arith.cmpi sge, %21, %22 : vector<8x128xi32>
    %c45_i32 = arith.constant 45 : i32
    %24 = vector.broadcast %c45_i32 : i32 to vector<8x128xi32>
    %25 = arith.cmpi slt, %21, %24 : vector<8x128xi32>
    %26 = arith.andi %23, %25 : vector<8x128xi1>
    %cst_15 = arith.constant 0xFF800000 : f32
    %27 = vector.broadcast %cst_15 : f32 to vector<8x128xf32>
    %28 = arith.select %26, %15, %27 : vector<8x128xi1>, vector<8x128xf32>
    %cst_16 = arith.constant dense<0xFF800000> : vector<8xf32>
    %29 = vector.multi_reduction <maximumf>, %28, %cst_16 [1] : vector<8x128xf32> to vector<8xf32>
    %30 = vector.shape_cast %29 : vector<8xf32> to vector<8x1xf32>
    %31 = vector.broadcast %30 : vector<8x1xf32> to vector<8x128xf32>
    %32 = arith.subf %28, %31 : vector<8x128xf32>
    %33 = math.exp %32 : vector<8x128xf32>
    %cst_17 = arith.constant dense<0.000000e+00> : vector<8xf32>
    %34 = vector.multi_reduction <add>, %33, %cst_17 [1] : vector<8x128xf32> to vector<8xf32>
    %35 = vector.shape_cast %34 : vector<8xf32> to vector<8x1xf32>
    %36 = vector.broadcast %35 : vector<8x1xf32> to vector<8x128xf32>
    %37 = arith.divf %33, %36 : vector<8x128xf32>
    %38 = arith.select %26, %37, %20 : vector<8x128xi1>, vector<8x128xf32>
    %c0_18 = arith.constant 0 : index
    %c0_19 = arith.constant 0 : index
    %39 = vector.load %arg6[%c0_18, %c0_19] : memref<8x128xf32, #tpu.memory_space<vmem>>, vector<8x128xf32>
    tpu.vector_store %arg6[%c0_18, %c0_19], %38 {strides = array<i32>} : memref<8x128xf32, #tpu.memory_space<vmem>>, vector<8x128xf32>,
    return
  }
  func.func @transform_0(%arg0: i32) -> (i32, i32, i32) {
    %c0_i32 = arith.constant 0 : i32
    %c0_i32_0 = arith.constant 0 : i32
    %c0_i32_1 = arith.constant 0 : i32
    return %arg0, %c0_i32, %c0_i32_0 : i32, i32, i32
  }
  func.func @transform_1(%arg0: i32) -> (i32, i32) {
    %c0_i32 = arith.constant 0 : i32
    %c0_i32_0 = arith.constant 0 : i32
    %c0_i32_1 = arith.constant 0 : i32
    return %c0_i32, %c0_i32_0 : i32, i32
  }
  func.func @transform_2(%arg0: i32) -> (i32, i32) {
    %c0_i32 = arith.constant 0 : i32
    %c0_i32_0 = arith.constant 0 : i32
    %c0_i32_1 = arith.constant 0 : i32
    return %c0_i32, %c0_i32_0 : i32, i32
  }
  func.func @transform_3(%arg0: i32) -> (i32, i32) {
    %c0_i32 = arith.constant 0 : i32
    %c0_i32_0 = arith.constant 0 : i32
    %c0_i32_1 = arith.constant 0 : i32
    return %c0_i32, %c0_i32_0 : i32, i32
  }
  func.func @transform_4(%arg0: i32) -> (i32, i32) {
    %c0_i32 = arith.constant 0 : i32
    %c0_i32_0 = arith.constant 0 : i32
    %c0_i32_1 = arith.constant 0 : i32
    return %c0_i32, %c0_i32_0 : i32, i32
  }
  func.func @transform_5(%arg0: i32) -> (i32, i32) {
    %c0_i32 = arith.constant 0 : i32
    %c0_i32_0 = arith.constant 0 : i32
    return %arg0, %c0_i32 : i32, i32
  }
}

</mosaic_0001>

<bundles_post_ra>
// kernel: tpu_custom_call.1
= control target key start
LH: loop header
LB: loop body
LE: loop exit
PB: predicated region body
PF: predicated region fallthrough
CT: control target
= control target key end

     0   :  { %10 = vsyncpa [#allocation3], 0  ;;  %s744_s0 = inlined_call_operand.hbm [shape: f32[8,16,256], index: 0, kind: input, shape index: {}]   ;;  %s745_s1 = inlined_call_operand.hbm [shape: f32[16,16], index: 1, kind: input, shape index: {}]   ;;  %s746_s2 = inlined_call_operand.vmem [shape: f32[1,16], index: 2, kind: input, shape index: {}]   ;;  %s747_s3 = inlined_call_operand.hbm [shape: f32[16,128], index: 3, kind: input, shape index: {}]   ;;  %s748_s4 = inlined_call_operand.vmem [shape: f32[1,128], index: 4, kind: input, shape index: {}]   ;;  %s749_s5 = inlined_call_operand.hbm [shape: f32[8,128], index: 5, kind: output, shape index: {}]  }
   0x1   :  { %11 = vsyncpa [#allocation6], 0 }
   0x2   :  { %12 = vsyncpa [#allocation4], 0  ;;  %s610_s18 = smov [#allocation5]   ;;  %s516_s22 = scalar_lea.hbm %s745_s1, 256 }
   0x3   :  { %s30_s19 = sshll.u32 %s610_s18, 4  ;;  %p517_p0 = scmp.ne.s32.totalorder %s745_s1, %s516_s22  ;;  %s31_s19 = int_to_ptr.vmem [resolvable:$true] %s30_s19 }
   0x4   :  { %p520_p1 = scmp.lt.u32.totalorder %s516_s22, %s745_s1 }
   0x6   :  { %p522_p2 = pnand %p520_p1, %p517_p0 }
   0x8   :  { %525 = shalt.err (!%p522_p2)
}
   0x9   :  { %s526_s27 = scalar_lea.vmem %s31_s19, 256  ;;  %p531_p4 = scmp.lt.s32.totalorder %s31_s19, %s31_s19 }
   0xa   :  { %p527_p3 = scmp.ne.s32.totalorder %s31_s19, %s526_s27  ;;  %p532_p5 = scmp.lt.s32.totalorder %s526_s27, %s526_s27 }
   0xc   :  { %p533_p6 = por %p532_p5, %p531_p4 }
   0xe   :  { %p534_p7 = pnand %p533_p6, %p527_p3 }
  0x10   :  { %537 = shalt.err (!%p534_p7)
}
  0x11   :  { %s611_s28 = smov 128   ;;  %s612_s29 = smov 8  }
  0x12   :  { %36 = dma.hbm_to_vmem [thread:$0]  %s745_s1, 256, %s31_s19, [#allocation6], %s611_s28, %s611_s28, %s612_s29  }
  0x13   :  { %s613_s7 = smov [#allocation2]   ;;  %s538_s11 = scalar_lea.hbm %s744_s0, 4096 }
  0x14   :  { %s18_s8 = sshll.u32 %s613_s7, 4  ;;  %p539_p8 = scmp.ne.s32.totalorder %s744_s0, %s538_s11  ;;  %s19_s8 = int_to_ptr.vmem [resolvable:$true] %s18_s8 }
  0x15   :  { %p542_p9 = scmp.lt.u32.totalorder %s538_s11, %s744_s0 }
  0x17   :  { %p544_p10 = pnand %p542_p9, %p539_p8 }
  0x19   :  { %547 = shalt.err (!%p544_p10)
}
  0x1a   :  { %s548_s16 = scalar_lea.vmem %s19_s8, 4096  ;;  %p553_p12 = scmp.lt.s32.totalorder %s19_s8, %s19_s8 }
  0x1b   :  { %p549_p11 = scmp.ne.s32.totalorder %s19_s8, %s548_s16  ;;  %p554_p13 = scmp.lt.s32.totalorder %s548_s16, %s548_s16 }
  0x1d   :  { %p555_p0 = por %p554_p13, %p553_p12 }
  0x1f   :  { %p556_p1 = pnand %p555_p0, %p549_p11 }
  0x21   :  { %559 = shalt.err (!%p556_p1)
}
  0x22   :  { %s614_s1 = smov 256   ;;  %s615_s17 = smov 16  }
  0x23   :  { %24 = dma.hbm_to_vmem [thread:$0]  %s744_s0, 4096, %s19_s8, [#allocation3], %s614_s1, %s614_s1, %s615_s17  }
  0x24   :  { %s616_s20 = smov [#allocation7]   ;;  %s560_s24 = scalar_lea.hbm %s747_s3, 256 }
  0x25   :  { %s44_s21 = sshll.u32 %s616_s20, 4  ;;  %p561_p2 = scmp.ne.s32.totalorder %s747_s3, %s560_s24  ;;  %s45_s21 = int_to_ptr.vmem [resolvable:$true] %s44_s21 }
  0x26   :  { %p564_p3 = scmp.lt.u32.totalorder %s560_s24, %s747_s3 }
  0x28   :  { %p566_p4 = pnand %p564_p3, %p561_p2 }
  0x2a   :  { %569 = shalt.err (!%p566_p4)
}
  0x2b   :  { %s570_s6 = scalar_lea.vmem %s45_s21, 256  ;;  %p575_p6 = scmp.lt.s32.totalorder %s45_s21, %s45_s21 }
  0x2c   :  { %p571_p5 = scmp.ne.s32.totalorder %s45_s21, %s570_s6  ;;  %p576_p7 = scmp.lt.s32.totalorder %s570_s6, %s570_s6 }
  0x2e   :  { %p577_p8 = por %p576_p7, %p575_p6 }
  0x30   :  { %p578_p9 = pnand %p577_p8, %p571_p5 }
  0x32   :  { %581 = shalt.err (!%p578_p9)
}
  0x33   :  { %50 = dma.hbm_to_vmem [thread:$0]  %s747_s3, 256, %s45_s21, [#allocation6], %s611_s28, %s611_s28, %s612_s29  }
  0x34   :  { %604 = dma.done.wait [#allocation3], 4096  }
  0x35   :  { %605 = vsyncadd [#allocation3], 4294963200 }
  0x36   :  { %606 = dma.done.wait [#allocation6], 512  }
  0x37   :  { %607 = vsyncadd [#allocation6], 4294966784  ;;  %v66_v0 = vld [vmem:[#allocation2 + $0x20] sm:$0xff]  ;;  %v67_v1 = vld [vmem:[#allocation2 + $0x28] sm:$0xff]  ;;  %v617_v51 = vmov 0.0|0.0   ;;  %vm618_vm0 = vmmov 0   ;;  %v183_v57 = vlaneseq }
  0x38   :  { %v62_v2 = vld [vmem:[#allocation2] sm:$0xff]  ;;  %v100_v3 = vadd.f32 %v67_v1, %v66_v0  ;;  %v63_v4 = vld [vmem:[#allocation2 + $0x8] sm:$0xff]  ;;  %v68_v5 = vld [vmem:[#allocation2 + $0x30] sm:$0xff]  ;;  %491 = vmatprep.subr.bf16.mxu0 %v617_v51  ;;  %494 = vmatprep.subr.bf16.mxu1 %v617_v51  ;;  %v619_v52 = vmov 0.0   ;;  %vm194_vm1 = vcmask 130112   ;;  %vm259_vm2 = vcmask 1041409  }
  0x39   :  { %v69_v6 = vld [vmem:[#allocation2 + $0x38] sm:$0xff]  ;;  %v94_v7 = vadd.f32 %v63_v4, %v62_v2  ;;  %v64_v8 = vld [vmem:[#allocation2 + $0x10] sm:$0xff]  ;;  %v70_v14 = vld [vmem:[#allocation2 + $0x40] sm:$0xff]  ;;  %481 = vmatprep.mubr.msk.f32.mxu0 %vm618_vm0, %v619_v52  ;;  %488 = vmatprep.mubr.msk.f32.mxu1 %vm618_vm0, %v619_v52  ;;  %v693_v60 = vand.u32 127, %v183_v57  ;;  %v186_v0 = vshrl.u32 %v183_v57, 7  ;;  %vm261_vm3 = vcmask 1042434  }
  0x3a   :  { %v65_v9 = vld [vmem:[#allocation2 + $0x18] sm:$0xff]  ;;  %101 = vadd.xlane.f32.xlu1 %v100_v3  ;;  %v103_v10 = vadd.f32 %v69_v6, %v68_v5  ;;  %v72_v12 = vld [vmem:[#allocation2 + $0x50] sm:$0xff]  ;;  %v71_v15 = vld [vmem:[#allocation2 + $0x48] sm:$0xff]  ;;  %vm263_vm4 = vcmask 1043459   ;;  %vm265_vm5 = vcmask 1044484   ;;  %vm267_vm6 = vcmask 1045509  }
  0x3b   :  { %95 = vadd.xlane.f32.xlu0 %v94_v7  ;;  %v97_v11 = vadd.f32 %v65_v9, %v64_v8  ;;  %v73_v13 = vld [vmem:[#allocation2 + $0x58] sm:$0xff]  ;;  %v106_v17 = vadd.f32 %v71_v15, %v70_v14  ;;  %v76_v18 = vld [vmem:[#allocation2 + $0x70] sm:$0xff]  ;;  %v74_v20 = vld [vmem:[#allocation2 + $0x60] sm:$0xff]  ;;  %v189_v62 = vadd.s32 4294967288, %v693_v60  ;;  %v187_v6 = vsub.s32 %v693_v60, %v186_v0 }
  0x3c   :  { %v109_v16 = vadd.f32 %v73_v13, %v72_v12  ;;  %v77_v19 = vld [vmem:[#allocation2 + $0x78] sm:$0xff]  ;;  %v75_v21 = vld [vmem:[#allocation2 + $0x68] sm:$0xff]  ;;  %v80_v24 = vld [vmem:[#allocation2 + $0x90] sm:$0xff]  ;;  %vm269_vm7 = vcmask 1046534   ;;  %vm271_vm8 = vcmask 1047559   ;;  %vm273_vm9 = vcmask 130048  }
  0x3d   :  { %v115_v22 = vadd.f32 %v77_v19, %v76_v18  ;;  %v112_v23 = vadd.f32 %v75_v21, %v74_v20  ;;  %v81_v25 = vld [vmem:[#allocation2 + $0x98] sm:$0xff]  ;;  %v78_v26 = vld [vmem:[#allocation2 + $0x80] sm:$0xff]  ;;  %v79_v27 = vld [vmem:[#allocation2 + $0x88] sm:$0xff]  ;;  %v696_v2 = vsub.s32 %v189_v62, %v186_v0  ;;  %vm435_vm10 = vcmp.ge.s32.totalorder %v693_v60, 41 }
  0x3e   :  { %104 = vadd.xlane.f32.xlu1 %v103_v10  ;;  %v121_v28 = vadd.f32 %v81_v25, %v80_v24  ;;  %v118_v29 = vadd.f32 %v79_v27, %v78_v26  ;;  %v84_v30 = vld [vmem:[#allocation2 + $0xb0] sm:$0xff]  ;;  %v85_v31 = vld [vmem:[#allocation2 + $0xb8] sm:$0xff]  ;;  %v82_v32 = vld [vmem:[#allocation2 + $0xa0] sm:$0xff]  ;;  %vm436_vm11 = vcmp.lt.s32.totalorder %v693_v60, 45 }
  0x3f   :  { %98 = vadd.xlane.f32.xlu0 %v97_v11  ;;  %v83_v33 = vld [vmem:[#allocation2 + $0xa8] sm:$0xff]  ;;  %v127_v34 = vadd.f32 %v85_v31, %v84_v30  ;;  %v88_v36 = vld [vmem:[#allocation2 + $0xd0] sm:$0xff]  ;;  %v89_v37 = vld [vmem:[#allocation2 + $0xd8] sm:$0xff] }
  0x40   :  { %v124_v35 = vadd.f32 %v83_v33, %v82_v32  ;;  %v86_v38 = vld [vmem:[#allocation2 + $0xc0] sm:$0xff]  ;;  %v87_v39 = vld [vmem:[#allocation2 + $0xc8] sm:$0xff]  ;;  %v133_v40 = vadd.f32 %v89_v37, %v88_v36  ;;  %v92_v42 = vld [vmem:[#allocation2 + $0xf0] sm:$0xff] }
  0x41   :  { %v130_v41 = vadd.f32 %v87_v39, %v86_v38  ;;  %v93_v43 = vld [vmem:[#allocation2 + $0xf8] sm:$0xff]  ;;  %v90_v44 = vld [vmem:[#allocation2 + $0xe0] sm:$0xff]  ;;  %v91_v45 = vld [vmem:[#allocation2 + $0xe8] sm:$0xff] }
  0x42   :  { %110 = vadd.xlane.f32.xlu1 %v109_v16  ;;  %v139_v46 = vadd.f32 %v93_v43, %v92_v42  ;;  %v136_v47 = vadd.f32 %v91_v45, %v90_v44  ;;  %v158_v48 = vld [vmem:[#allocation5] sm:$0xff]  ;;  %v159_v49 = vld [vmem:[#allocation5 + $0x8] sm:$0xff]  ;;  %vm724_vm12 = vmand %vm435_vm10, %vm436_vm11 }
  0x43   :  { %107 = vadd.xlane.f32.xlu0 %v106_v17  ;;  %v492_v50 = vpack.c.bf16 %v159_v49, %v158_v48  ;;  %v466_v62 = vld [vmem:[%s746_s2] ss:$0 sm:$0xff]  ;;  %s620_s2 = smov [#allocation8]  }
  0x45   :  { %493 = vmatpush3.bf16.msra.mxu0 %v492_v50 }
  0x46   :  { %116 = vadd.xlane.f32.xlu1 %v115_v22 }
  0x47   :  { %113 = vadd.xlane.f32.xlu0 %v112_v23 }
  0x4a   :  { %122 = vadd.xlane.f32.xlu1 %v121_v28 }
  0x4b   :  { %119 = vadd.xlane.f32.xlu0 %v118_v29 }
  0x4e   :  { %128 = vadd.xlane.f32.xlu1 %v127_v34 }
  0x4f   :  { %125 = vadd.xlane.f32.xlu0 %v124_v35 }
  0x52   :  { %134 = vadd.xlane.f32.xlu1 %v133_v40 }
  0x53   :  { %131 = vadd.xlane.f32.xlu0 %v130_v41 }
  0x56   :  { %140 = vadd.xlane.f32.xlu1 %v139_v46 }
  0x57   :  { %137 = vadd.xlane.f32.xlu0 %v136_v47 }
  0xc7   :  { %v102_v53 = vpop.xlane.xlu1 %101 }
  0xc8   :  { %v96_v54 = vpop.xlane.xlu0 %95  ;;  %v144_v7 = vmul.f32 0.00390625, %v102_v53 }
  0xc9   :  { %v142_v10 = vmul.f32 0.00390625, %v96_v54 }
  0xca   :  { %v199_v21 = vrot.slane %v144_v7, %v187_v6 }
  0xcb   :  { %v105_v55 = vpop.xlane.xlu1 %104  ;;  %v188_v24 = vrot.slane %v142_v10, %v187_v6 }
  0xcc   :  { %v99_v56 = vpop.xlane.xlu0 %98  ;;  %v145_v3 = vmul.f32 0.00390625, %v105_v55 }
  0xcd   :  { %v143_v5 = vmul.f32 0.00390625, %v99_v56 }
  0xce   :  { %v203_v14 = vrot.slane %v145_v3, %v696_v2  ;;  %v468_v3 = vld [vmem:[%s748_s4] ss:$0 sm:$0xff]  ;;  %s456_s4 = sshll.u32 %s620_s2, 4  ;;  %s457_s4 = int_to_ptr.vmem [resolvable:$true] %s456_s4 }
  0xcf   :  { %v111_v58 = vpop.xlane.xlu1 %110  ;;  %v193_v18 = vrot.slane %v143_v5, %v696_v2  ;;  %s582_s9 = scalar_lea.vmem %s457_s4, 128  ;;  %p587_p11 = scmp.lt.s32.totalorder %s457_s4, %s457_s4 }
  0xd0   :  { %v108_v59 = vpop.xlane.xlu0 %107  ;;  %v147_v8 = vmul.f32 0.00390625, %v111_v58  ;;  %v204_v28 = vsel %vm194_vm1, %v203_v14, %v199_v21  ;;  %v347_v58 = vld [vmem:[#allocation7] sm:$0xff]  ;;  %p583_p10 = scmp.ne.s32.totalorder %s457_s4, %s582_s9  ;;  %p588_p12 = scmp.lt.s32.totalorder %s582_s9, %s582_s9 }
  0xd1   :  { %v146_v9 = vmul.f32 0.00390625, %v108_v59  ;;  %v195_v33 = vsel %vm194_vm1, %v193_v18, %v188_v24  ;;  %v348_v59 = vld [vmem:[#allocation7 + $0x8] sm:$0xff] }
  0xd2   :  { %v212_v22 = vrot.slane %v147_v8, %v696_v2  ;;  %v260_v42 = vsel %vm259_vm2, %v204_v28, %v195_v33  ;;  %p589_p13 = por %p588_p12, %p587_p11 }
  0xd3   :  { %v117_v61 = vpop.xlane.xlu1 %116  ;;  %v208_v23 = vrot.slane %v146_v9, %v187_v6 }
  0xd4   :  { %v114_v63 = vpop.xlane.xlu0 %113  ;;  %v149_v11 = vmul.f32 0.00390625, %v117_v61  ;;  %v495_v61 = vpack.c.bf16 %v348_v59, %v347_v58  ;;  %p590_p0 = pnand %p589_p13, %p583_p10 }
  0xd5   :  { %v148_v12 = vmul.f32 0.00390625, %v114_v63  ;;  %v213_v37 = vsel %vm194_vm1, %v212_v22, %v208_v23 }
  0xd6   :  { %v221_v25 = vrot.slane %v149_v11, %v696_v2  ;;  %v262_v46 = vsel %vm261_vm3, %v213_v37, %v260_v42  ;;  %496 = vmatpush3.bf16.msra.mxu1 %v495_v61 }
  0xd7   :  { %v123_v1 = vpop.xlane.xlu1 %122  ;;  %v217_v26 = vrot.slane %v148_v12, %v187_v6 }
  0xd8   :  { %v120_v4 = vpop.xlane.xlu0 %119  ;;  %v151_v15 = vmul.f32 0.00390625, %v123_v1 }
  0xd9   :  { %v150_v16 = vmul.f32 0.00390625, %v120_v4  ;;  %v222_v39 = vsel %vm194_vm1, %v221_v25, %v217_v26 }
  0xda   :  { %v230_v29 = vrot.slane %v151_v15, %v696_v2  ;;  %v264_v49 = vsel %vm263_vm4, %v222_v39, %v262_v46 }
  0xdb   :  { %v129_v13 = vpop.xlane.xlu1 %128  ;;  %v226_v30 = vrot.slane %v150_v16, %v187_v6 }
  0xdc   :  { %v126_v17 = vpop.xlane.xlu0 %125  ;;  %v153_v19 = vmul.f32 0.00390625, %v129_v13 }
  0xdd   :  { %v152_v20 = vmul.f32 0.00390625, %v126_v17  ;;  %v231_v43 = vsel %vm194_vm1, %v230_v29, %v226_v30 }
  0xde   :  { %v239_v34 = vrot.slane %v153_v19, %v696_v2  ;;  %v266_v52 = vsel %vm265_vm5, %v231_v43, %v264_v49 }
  0xdf   :  { %v135_v27 = vpop.xlane.xlu1 %134  ;;  %v235_v35 = vrot.slane %v152_v20, %v187_v6 }
  0xe0   :  { %v155_v31 = vmul.f32 0.00390625, %v135_v27  ;;  %v132_v32 = vpop.xlane.xlu0 %131 }
  0xe1   :  { %v154_v36 = vmul.f32 0.00390625, %v132_v32  ;;  %v240_v47 = vsel %vm194_vm1, %v239_v34, %v235_v35 }
  0xe2   :  { %v248_v38 = vrot.slane %v155_v31, %v696_v2  ;;  %v268_v54 = vsel %vm267_vm6, %v240_v47, %v266_v52 }
  0xe3   :  { %v244_v40 = vrot.slane %v154_v36, %v187_v6  ;;  %v141_v41 = vpop.xlane.xlu1 %140 }
  0xe4   :  { %v157_v44 = vmul.f32 0.00390625, %v141_v41  ;;  %v138_v45 = vpop.xlane.xlu0 %137 }
  0xe5   :  { %v156_v48 = vmul.f32 0.00390625, %v138_v45  ;;  %v249_v50 = vsel %vm194_vm1, %v248_v38, %v244_v40 }
  0xe6   :  { %v257_v51 = vrot.slane %v157_v44, %v696_v2  ;;  %v270_v56 = vsel %vm269_vm7, %v249_v50, %v268_v54 }
  0xe7   :  { %v253_v53 = vrot.slane %v156_v48, %v187_v6 }
  0xe9   :  { %v258_v55 = vsel %vm194_vm1, %v257_v51, %v253_v53 }
  0xea   :  { %v272_v57 = vsel %vm271_vm8, %v258_v55, %v270_v56 }
  0xeb   :  { %482 = vmatmul.mubr.msk.f32.vlgmr.msra.gmra.mrb[0].mxu0 %vm273_vm9, %v272_v57 }
 0x1be   :  { %v342_v63 = vpop.f32.mrb[0].mxu0 }
 0x1bf   :  { %v343_v0 = vadd.f32 %v466_v62, %v342_v63  ;;  %v483_v1 = vpop.f32.mrb[1].mxu0 }
 0x1c1   :  { %v346_v2 = vmax.f32 %v343_v0, 0.0 }
 0x1c3   :  { %489 = vmatmul.mubr.msk.f32.vlgmr.msra.gmra.mrb[0].mxu1 %vm273_vm9, %v346_v2 }
 0x296   :  { %v425_v4 = vpop.f32.mrb[0].mxu1 }
 0x297   :  { %v426_v6 = vadd.f32 %v468_v3, %v425_v4  ;;  %v490_v7 = vpop.f32.mrb[1].mxu1 }
 0x299   :  { %v438_v8 = vsel %vm724_vm12, %v426_v6, -inf  ;;  %v470_v12 = vmul.f32 -1.442695, %v426_v6 }
 0x29a   :  { %439 = vmax.xlane.f32.xlu0 %v438_v8 }
 0x327   :  { %v440_v9 = vpop.xlane.xlu0 %439 }
 0x328   :  { %v441_v10 = vsub.f32 %v438_v8, %v440_v9 }
 0x32a   :  { %v442_v11 = vmul.f32 1.442695, %v441_v10 }
 0x32c   :  { %508 = vpow2.f32 %v442_v11 }
 0x32d   :  { %510 = vpow2.f32 %v470_v12 }
 0x336   :  { %v509_v60 = vpop.eup %508 }
 0x337   :  { %444 = vadd.xlane.f32.xlu1 %v509_v60  ;;  %v511_v13 = vpop.eup %510 }
 0x338   :  { %v432_v14 = vadd.f32 1.0, %v511_v13 }
 0x3c4   :  { %v445_v15 = vpop.xlane.xlu1 %444 }
 0x3c5   :  { %512 = vrcp.f32 %v445_v15 }
 0x3c6   :  { %514 = vrcp.f32 %v432_v14 }
 0x3cf   :  { %v513_v16 = vpop.eup %512 }
 0x3d0   :  { %v447_v17 = vmul.f32 %v513_v16, %v509_v60  ;;  %v515_v18 = vpop.eup %514 }
 0x3d2   :  { %v448_v19 = vsel %vm724_vm12, %v447_v17, %v515_v18 }
 0x3d3   :  { %449 = vst [vmem:[#allocation8] sm:$0xff] %v448_v19 }
 0x3d4   :  { %593 = shalt.err (!%p590_p0)
}
 0x3d5   :  { %s594_s12 = scalar_lea.hbm %s749_s5, 128 }
 0x3d6   :  { %p595_p1 = scmp.ne.s32.totalorder %s749_s5, %s594_s12  ;;  %p598_p2 = scmp.lt.u32.totalorder %s594_s12, %s749_s5 }
 0x3d8   :  { %p600_p3 = pnand %p598_p2, %p595_p1 }
 0x3da   :  { %603 = shalt.err (!%p600_p3)
}
 0x3db   :  { %459 = dma.vmem_to_hbm [thread:$0]  %s457_s4, 128, %s749_s5, [#allocation4]  }
 0x3dc   :  { %608 = dma.done.wait [#allocation4], 128  }
 0x3dd   :  { %609 = vsyncadd [#allocation4], 4294967168 }
 0x3de   :  { %463 = vsyncpa [#allocation3], 1 }
 0x3df   :  { %464 = vsyncpa [#allocation6], 1 }
 0x3e0   :  { %465 = vsyncpa [#allocation4], 1 }

</bundles_post_ra>
